<compile_context>
chip_gen: v7x
topology: tpu7x:2x2x1
jax: 0.10.0
libtpu: 0.0.40
codegen_flags: <defaults>
</compile_context>

<pallas_src>
import functools

import jax
import jax.numpy as jnp
from jax.experimental import pallas as pl
from jax.experimental.pallas import tpu as pltpu

LOG_SIG_MAX = 2.0
LOG_SIG_MIN = -20.0


def _policy_kernel(x_ref, w1_ref, b1_ref, w2_ref, b2_ref,
                   wm_ref, bm_ref, ws_ref, bs_ref,
                   mean_ref, log_std_ref):
    # x_ref: [Bt, num_inputs] in its native (batch-major) layout.
    x = x_ref[...]
    # Layer 1: contract the input-feature dim of BOTH operands so the result
    # is feature-major [hidden, Bt] (batch on the lane axis) without any
    # host- or kernel-side transpose of the activation tile.
    h1 = jax.lax.dot_general(w1_ref[...], x, (((1,), (1,)), ((), ())),
                             preferred_element_type=jnp.float32)
    h1 = jnp.maximum(h1 + b1_ref[...], 0.0)          # lane-dense VPU ops
    # Layer 2: standard [H, H] @ [H, Bt] -> [H, Bt].
    h2 = jnp.dot(w2_ref[...], h1, preferred_element_type=jnp.float32)
    h2 = jnp.maximum(h2 + b2_ref[...], 0.0)
    # Heads (feature-major): [A, H] @ [H, Bt] -> [A, Bt].
    mean_fm = jnp.dot(wm_ref[...], h2, preferred_element_type=jnp.float32) + bm_ref[...]
    ls_fm = jnp.dot(ws_ref[...], h2, preferred_element_type=jnp.float32) + bs_ref[...]
    ls_fm = jnp.clip(ls_fm, LOG_SIG_MIN, LOG_SIG_MAX)  # clamp only the log_std rows
    # Small XLU transposes ([A, Bt] -> [Bt, A]) so the outputs are emitted
    # batch-major and the wrapper needs zero layout plumbing.
    mean_ref[...] = mean_fm.T.astype(mean_ref.dtype)
    log_std_ref[...] = ls_fm.T.astype(log_std_ref.dtype)


def _choose_block_b(batch):
    """Whole batch for small B; ~1-2K-row tiles for large B (pipelining + 2 TCs)."""
    if batch < 4096 or batch % 128 != 0:
        return batch
    for cand in (2048, 1024, 512, 256, 128):
        if batch % cand == 0:
            return cand
    return batch


def prepare_params(params):
    """One-time preprocessing (kept OUT of the per-call hot path): biases as columns."""
    w1, b1, w2, b2, wm, bm, ws, bs = params           # PyTorch layout: w is [out, in]
    hidden_dim = w1.shape[0]
    num_actions = wm.shape[0]
    return (w1, b1.reshape(hidden_dim, 1),
            w2, b2.reshape(hidden_dim, 1),
            wm, bm.reshape(num_actions, 1),
            ws, bs.reshape(num_actions, 1))


@functools.partial(jax.jit, static_argnames=("block_b",))
def gaussian_policy_forward(state, prepared_params, *, block_b=None):
    """Fused MLP forward. state: [B, num_inputs] f32 -> (mean, log_std), each [B, A]."""
    B, num_inputs = state.shape
    w1, b1c, w2, b2c, wm, bmc, ws, bsc = prepared_params
    hidden_dim = w1.shape[0]
    num_actions = wm.shape[0]

    if block_b is None:
        block_b = _choose_block_b(B)
    assert B % block_b == 0, "batch must be divisible by block_b"
    grid = (B // block_b,)

    def const(shape):
        return pl.BlockSpec(shape, lambda i: (0, 0))

    out_spec = pl.BlockSpec((block_b, num_actions), lambda i: (i, 0))
    out_shape = jax.ShapeDtypeStruct((B, num_actions), jnp.float32)

    mean, log_std = pl.pallas_call(
        _policy_kernel,
        out_shape=(out_shape, out_shape),
        grid_spec=pl.GridSpec(
            grid=grid,
            in_specs=[
                pl.BlockSpec((block_b, num_inputs), lambda i: (i, 0)),  # state tile (native layout)
                const((hidden_dim, num_inputs)),        # w1
                const((hidden_dim, 1)),                 # b1
                const((hidden_dim, hidden_dim)),        # w2
                const((hidden_dim, 1)),                 # b2
                const((num_actions, hidden_dim)),       # wm
                const((num_actions, 1)),                # bm
                const((num_actions, hidden_dim)),       # ws
                const((num_actions, 1)),                # bs
            ],
            out_specs=(out_spec, out_spec),
        ),
        compiler_params=pltpu.CompilerParams(
            dimension_semantics=("parallel",)),
    )(state, w1, b1c, w2, b2c, wm, bmc, ws, bsc)
    return mean, log_std


def xavier_uniform(key, fan_out, fan_in, gain=1.0):
    # torch.nn.init.xavier_uniform_ (gain=1): U(-a, a), a = gain*sqrt(6/(fi+fo)).
    # Stored in PyTorch-native [out, in] layout.
    a = gain * jnp.sqrt(6.0 / (fan_in + fan_out))
    return jax.random.uniform(key, (fan_out, fan_in), jnp.float32, minval=-a, maxval=a)


def init_params(key, num_inputs, num_actions, hidden_dim):
    k1, k2, k3, k4 = jax.random.split(key, 4)
    w1 = xavier_uniform(k1, hidden_dim, num_inputs)
    b1 = jnp.zeros((hidden_dim,), jnp.float32)
    w2 = xavier_uniform(k2, hidden_dim, hidden_dim)
    b2 = jnp.zeros((hidden_dim,), jnp.float32)
    wm = xavier_uniform(k3, num_actions, hidden_dim)
    bm = jnp.zeros((num_actions,), jnp.float32)
    ws = xavier_uniform(k4, num_actions, hidden_dim)
    bs = jnp.zeros((num_actions,), jnp.float32)
    return (w1, b1, w2, b2, wm, bm, ws, bs)


def reference_forward(state, params):
    w1, b1, w2, b2, wm, bm, ws, bs = params
    h1 = jnp.maximum(state @ w1.T + b1, 0.0)
    h2 = jnp.maximum(h1 @ w2.T + b2, 0.0)
    mean = h2 @ wm.T + bm
    log_std = jnp.clip(h2 @ ws.T + bs, LOG_SIG_MIN, LOG_SIG_MAX)
    return mean, log_std


if __name__ == "__main__":
    num_inputs, num_actions, hidden_dim = 16, 8, 32
    batch = 128   # multiple of 128 so the lane axis is fully dense
    key = jax.random.PRNGKey(0)
    pkey, skey = jax.random.split(key)
    params = init_params(pkey, num_inputs, num_actions, hidden_dim)
    prepped = prepare_params(params)   # one-time: biases -> column vectors
    state = jax.random.normal(skey, (batch, num_inputs), jnp.float32)

    mean, log_std = gaussian_policy_forward(state, prepped)   # whole batch, grid=(1,)
    jax.block_until_ready((mean, log_std))

    mean_ref, log_std_ref = reference_forward(state, params)
    assert mean.shape == (batch, num_actions)
    assert log_std.shape == (batch, num_actions)
    assert jnp.allclose(mean, mean_ref, atol=1e-5, rtol=1e-5)
    assert jnp.allclose(log_std, log_std_ref, atol=1e-5, rtol=1e-5)

    # Also exercise the multi-step (tiled, pipelined) path to check BlockSpecs.
    state2 = jax.random.normal(jax.random.PRNGKey(1), (256, num_inputs), jnp.float32)
    m2, ls2 = gaussian_policy_forward(state2, prepped, block_b=128)
    jax.block_until_ready((m2, ls2))
    m2r, ls2r = reference_forward(state2, params)
    assert jnp.allclose(m2, m2r, atol=1e-5, rtol=1e-5)
    assert jnp.allclose(ls2, ls2r, atol=1e-5, rtol=1e-5)

    # TODO(synk): sample() (rsample + tanh squash + log_prob) relies on
    # torch.distributions semantics; only forward() is implemented in-kernel.
    print("KERNEL_OK")
</pallas_src>

<mosaic_0001>
module attributes {stable_mosaic.version = 11 : i64} {
  func.func @_policy_kernel(%arg0: i32, %arg1: memref<128x16xf32, #tpu.memory_space<vmem>>, %arg2: memref<32x16xf32, #tpu.memory_space<vmem>>, %arg3: memref<32x1xf32, #tpu.memory_space<vmem>>, %arg4: memref<32x32xf32, #tpu.memory_space<vmem>>, %arg5: memref<32x1xf32, #tpu.memory_space<vmem>>, %arg6: memref<8x32xf32, #tpu.memory_space<vmem>>, %arg7: memref<8x1xf32, #tpu.memory_space<vmem>>, %arg8: memref<8x32xf32, #tpu.memory_space<vmem>>, %arg9: memref<8x1xf32, #tpu.memory_space<vmem>>, %arg10: memref<128x8xf32, #tpu.memory_space<vmem>>, %arg11: memref<128x8xf32, #tpu.memory_space<vmem>>) attributes {dimension_semantics = [#tpu.dimension_semantics<parallel>], iteration_bounds = array<i64: 1>, scalar_prefetch = 0 : i64, scratch_operands = 0 : i64, tpu.core_type = #tpu.core_type<tc>, window_params = [{transform_indices = @transform_0, window_bounds = array<i64: 128, 16>}, {pipeline_mode = #tpu.pipeline_mode<synchronous>, transform_indices = @transform_1, window_bounds = array<i64: 32, 16>}, {pipeline_mode = #tpu.pipeline_mode<synchronous>, transform_indices = @transform_2, window_bounds = array<i64: 32, 1>}, {pipeline_mode = #tpu.pipeline_mode<synchronous>, transform_indices = @transform_3, window_bounds = array<i64: 32, 32>}, {pipeline_mode = #tpu.pipeline_mode<synchronous>, transform_indices = @transform_4, window_bounds = array<i64: 32, 1>}, {pipeline_mode = #tpu.pipeline_mode<synchronous>, transform_indices = @transform_5, window_bounds = array<i64: 8, 32>}, {pipeline_mode = #tpu.pipeline_mode<synchronous>, transform_indices = @transform_6, window_bounds = array<i64: 8, 1>}, {pipeline_mode = #tpu.pipeline_mode<synchronous>, transform_indices = @transform_7, window_bounds = array<i64: 8, 32>}, {pipeline_mode = #tpu.pipeline_mode<synchronous>, transform_indices = @transform_8, window_bounds = array<i64: 8, 1>}, {transform_indices = @transform_9, window_bounds = array<i64: 128, 8>}, {transform_indices = @transform_10, window_bounds = array<i64: 128, 8>}]} {
    %c0 = arith.constant 0 : index
    %c0_0 = arith.constant 0 : index
    %0 = vector.load %arg1[%c0, %c0_0] : memref<128x16xf32, #tpu.memory_space<vmem>>, vector<128x16xf32>
    %c0_1 = arith.constant 0 : index
    %c0_2 = arith.constant 0 : index
    %1 = vector.load %arg2[%c0_1, %c0_2] : memref<32x16xf32, #tpu.memory_space<vmem>>, vector<32x16xf32>
    %cst = arith.constant dense<0.000000e+00> : vector<32x128xf32>
    %2 = tpu.matmul %1, %0, %cst {dimension_numbers = #tpu.dot_dimension_numbers<[1], [1], [0], [0], [0, 0, 1, 0], [], []>} : vector<32x16xf32>, vector<128x16xf32>, vector<32x128xf32> -> vector<32x128xf32>
    %c0_3 = arith.constant 0 : index
    %c0_4 = arith.constant 0 : index
    %3 = vector.load %arg3[%c0_3, %c0_4] : memref<32x1xf32, #tpu.memory_space<vmem>>, vector<32x1xf32>
    %4 = vector.broadcast %3 : vector<32x1xf32> to vector<32x128xf32>
    %5 = arith.addf %2, %4 : vector<32x128xf32>
    %cst_5 = arith.constant 0.000000e+00 : f32
    %6 = vector.broadcast %cst_5 : f32 to vector<32x128xf32>
    %7 = arith.maximumf %5, %6 : vector<32x128xf32>
    %c0_6 = arith.constant 0 : index
    %c0_7 = arith.constant 0 : index
    %8 = vector.load %arg4[%c0_6, %c0_7] : memref<32x32xf32, #tpu.memory_space<vmem>>, vector<32x32xf32>
    %cst_8 = arith.constant dense<0.000000e+00> : vector<32x128xf32>
    %9 = tpu.matmul %8, %7, %cst_8 {dimension_numbers = #tpu.dot_dimension_numbers<[1], [0], [0], [1], [0, 0, 1, 1], [], []>} : vector<32x32xf32>, vector<32x128xf32>, vector<32x128xf32> -> vector<32x128xf32>
    %c0_9 = arith.constant 0 : index
    %c0_10 = arith.constant 0 : index
    %10 = vector.load %arg5[%c0_9, %c0_10] : memref<32x1xf32, #tpu.memory_space<vmem>>, vector<32x1xf32>
    %11 = vector.broadcast %10 : vector<32x1xf32> to vector<32x128xf32>
    %12 = arith.addf %9, %11 : vector<32x128xf32>
    %cst_11 = arith.constant 0.000000e+00 : f32
    %13 = vector.broadcast %cst_11 : f32 to vector<32x128xf32>
    %14 = arith.maximumf %12, %13 : vector<32x128xf32>
    %c0_12 = arith.constant 0 : index
    %c0_13 = arith.constant 0 : index
    %15 = vector.load %arg6[%c0_12, %c0_13] : memref<8x32xf32, #tpu.memory_space<vmem>>, vector<8x32xf32>
    %cst_14 = arith.constant dense<0.000000e+00> : vector<8x128xf32>
    %16 = tpu.matmul %15, %14, %cst_14 {dimension_numbers = #tpu.dot_dimension_numbers<[1], [0], [0], [1], [0, 0, 1, 1], [], []>} : vector<8x32xf32>, vector<32x128xf32>, vector<8x128xf32> -> vector<8x128xf32>
    %c0_15 = arith.constant 0 : index
    %c0_16 = arith.constant 0 : index
    %17 = vector.load %arg7[%c0_15, %c0_16] : memref<8x1xf32, #tpu.memory_space<vmem>>, vector<8x1xf32>
    %18 = vector.broadcast %17 : vector<8x1xf32> to vector<8x128xf32>
    %19 = arith.addf %16, %18 : vector<8x128xf32>
    %c0_17 = arith.constant 0 : index
    %c0_18 = arith.constant 0 : index
    %20 = vector.load %arg8[%c0_17, %c0_18] : memref<8x32xf32, #tpu.memory_space<vmem>>, vector<8x32xf32>
    %cst_19 = arith.constant dense<0.000000e+00> : vector<8x128xf32>
    %21 = tpu.matmul %20, %14, %cst_19 {dimension_numbers = #tpu.dot_dimension_numbers<[1], [0], [0], [1], [0, 0, 1, 1], [], []>} : vector<8x32xf32>, vector<32x128xf32>, vector<8x128xf32> -> vector<8x128xf32>
    %c0_20 = arith.constant 0 : index
    %c0_21 = arith.constant 0 : index
    %22 = vector.load %arg9[%c0_20, %c0_21] : memref<8x1xf32, #tpu.memory_space<vmem>>, vector<8x1xf32>
    %23 = vector.broadcast %22 : vector<8x1xf32> to vector<8x128xf32>
    %24 = arith.addf %21, %23 : vector<8x128xf32>
    %cst_22 = arith.constant -2.000000e+01 : f32
    %cst_23 = arith.constant 2.000000e+00 : f32
    %25 = vector.broadcast %cst_22 : f32 to vector<8x128xf32>
    %26 = arith.maximumf %25, %24 : vector<8x128xf32>
    %27 = vector.broadcast %cst_23 : f32 to vector<8x128xf32>
    %28 = arith.minimumf %27, %26 : vector<8x128xf32>
    %29 = tpu.transpose %19, [1, 0] : vector<8x128xf32> -> vector<128x8xf32>
    %c0_24 = arith.constant 0 : index
    %c0_25 = arith.constant 0 : index
    %30 = vector.load %arg10[%c0_24, %c0_25] : memref<128x8xf32, #tpu.memory_space<vmem>>, vector<128x8xf32>
    tpu.vector_store %arg10[%c0_24, %c0_25], %29 {strides = array<i32>} : memref<128x8xf32, #tpu.memory_space<vmem>>, vector<128x8xf32>,
    %31 = tpu.transpose %28, [1, 0] : vector<8x128xf32> -> vector<128x8xf32>
    %c0_26 = arith.constant 0 : index
    %c0_27 = arith.constant 0 : index
    %32 = vector.load %arg11[%c0_26, %c0_27] : memref<128x8xf32, #tpu.memory_space<vmem>>, vector<128x8xf32>
    tpu.vector_store %arg11[%c0_26, %c0_27], %31 {strides = array<i32>} : memref<128x8xf32, #tpu.memory_space<vmem>>, vector<128x8xf32>,
    return
  }
  func.func @transform_0(%arg0: i32) -> (i32, i32) {
    %c0_i32 = arith.constant 0 : i32
    %c0_i32_0 = arith.constant 0 : i32
    return %arg0, %c0_i32 : i32, i32
  }
  func.func @transform_1(%arg0: i32) -> (i32, i32) {
    %c0_i32 = arith.constant 0 : i32
    %c0_i32_0 = arith.constant 0 : i32
    %c0_i32_1 = arith.constant 0 : i32
    return %c0_i32, %c0_i32_0 : i32, i32
  }
  func.func @transform_2(%arg0: i32) -> (i32, i32) {
    %c0_i32 = arith.constant 0 : i32
    %c0_i32_0 = arith.constant 0 : i32
    %c0_i32_1 = arith.constant 0 : i32
    return %c0_i32, %c0_i32_0 : i32, i32
  }
  func.func @transform_3(%arg0: i32) -> (i32, i32) {
    %c0_i32 = arith.constant 0 : i32
    %c0_i32_0 = arith.constant 0 : i32
    %c0_i32_1 = arith.constant 0 : i32
    return %c0_i32, %c0_i32_0 : i32, i32
  }
  func.func @transform_4(%arg0: i32) -> (i32, i32) {
    %c0_i32 = arith.constant 0 : i32
    %c0_i32_0 = arith.constant 0 : i32
    %c0_i32_1 = arith.constant 0 : i32
    return %c0_i32, %c0_i32_0 : i32, i32
  }
  func.func @transform_5(%arg0: i32) -> (i32, i32) {
    %c0_i32 = arith.constant 0 : i32
    %c0_i32_0 = arith.constant 0 : i32
    %c0_i32_1 = arith.constant 0 : i32
    return %c0_i32, %c0_i32_0 : i32, i32
  }
  func.func @transform_6(%arg0: i32) -> (i32, i32) {
    %c0_i32 = arith.constant 0 : i32
    %c0_i32_0 = arith.constant 0 : i32
    %c0_i32_1 = arith.constant 0 : i32
    return %c0_i32, %c0_i32_0 : i32, i32
  }
  func.func @transform_7(%arg0: i32) -> (i32, i32) {
    %c0_i32 = arith.constant 0 : i32
    %c0_i32_0 = arith.constant 0 : i32
    %c0_i32_1 = arith.constant 0 : i32
    return %c0_i32, %c0_i32_0 : i32, i32
  }
  func.func @transform_8(%arg0: i32) -> (i32, i32) {
    %c0_i32 = arith.constant 0 : i32
    %c0_i32_0 = arith.constant 0 : i32
    %c0_i32_1 = arith.constant 0 : i32
    return %c0_i32, %c0_i32_0 : i32, i32
  }
  func.func @transform_9(%arg0: i32) -> (i32, i32) {
    %c0_i32 = arith.constant 0 : i32
    %c0_i32_0 = arith.constant 0 : i32
    return %arg0, %c0_i32 : i32, i32
  }
  func.func @transform_10(%arg0: i32) -> (i32, i32) {
    %c0_i32 = arith.constant 0 : i32
    %c0_i32_0 = arith.constant 0 : i32
    return %arg0, %c0_i32 : i32, i32
  }
}

</mosaic_0001>

<bundles_post_ra>
// kernel: gaussian_policy_forward.1
= control target key start
LH: loop header
LB: loop body
LE: loop exit
PB: predicated region body
PF: predicated region fallthrough
CT: control target
= control target key end

     0   :  { %vm78_vm0 = vcmask 130048   ;;  %v837_v3 = vmov 0   ;;  %vm256_vm2 = vcmask 261120   ;;  %v838_v62 = vmov 0.0|0.0   ;;  %s1182_s0 = inlined_call_operand.vmem [shape: f32[128,16], index: 0, kind: input, shape index: {}]   ;;  %s1183_s1 = inlined_call_operand.vmem [shape: f32[32,16], index: 1, kind: input, shape index: {}]   ;;  %s1184_s2 = inlined_call_operand.vmem [shape: f32[32,1], index: 2, kind: input, shape index: {}]   ;;  %s1185_s4 = inlined_call_operand.vmem [shape: f32[32,1], index: 4, kind: input, shape index: {}]   ;;  %s1186_s8 = inlined_call_operand.vmem [shape: f32[8,1], index: 8, kind: input, shape index: {}]   ;;  %s1187_s6 = inlined_call_operand.vmem [shape: f32[8,1], index: 6, kind: input, shape index: {}]   ;;  %s1188_s3 = inlined_call_operand.vmem [shape: f32[32,32], index: 3, kind: input, shape index: {}]   ;;  %s1189_s5 = inlined_call_operand.vmem [shape: f32[8,32], index: 5, kind: input, shape index: {}]   ;;  %s1190_s7 = inlined_call_operand.vmem [shape: f32[8,32], index: 7, kind: input, shape index: {}]   ;;  %s1191_s9 = inlined_call_operand.vmem [shape: f32[128,8], index: 9, kind: output, shape index: {0}]   ;;  %s1192_s10 = inlined_call_operand.vmem [shape: f32[128,8], index: 10, kind: output, shape index: {1}]  }
   0x1   :  { %v34_v0 = vld [vmem:[%s1182_s0] sm:$0xff]  ;;  %v35_v1 = vld [vmem:[%s1182_s0 + $0x8] sm:$0xff]  ;;  %vm904_vm1 = vmpackc.low %vm78_vm0, %vm78_vm0  ;;  %835 = vset.pattern.permute.xlu0 %v837_v3  ;;  %836 = vset.pattern.permute.xlu1 %v837_v3  ;;  %vm839_vm3 = vmmov 0   ;;  %v840_v63 = vmov 0.0   ;;  %vm552_vm4 = vcmask 64512  }
   0x2   :  { %v763_v4 = vpack.c.bf16 %v35_v1, %v34_v0  ;;  %v36_v5 = vld [vmem:[%s1182_s0 + $0x10] sm:$0xff]  ;;  %v37_v6 = vld [vmem:[%s1182_s0 + $0x18] sm:$0xff]  ;;  %v50_v8 = vld [vmem:[%s1183_s1] sm:$0xff] }
   0x3   :  { %v769_v7 = vpack.c.bf16 %v37_v6, %v36_v5  ;;  %v38_v9 = vld [vmem:[%s1182_s0 + $0x20] sm:$0xff]  ;;  %v39_v10 = vld [vmem:[%s1182_s0 + $0x28] sm:$0xff]  ;;  %721 = vmatprep.mubr.msk.f32.mxu0 %vm78_vm0, %v50_v8  ;;  %v56_v12 = vld [vmem:[%s1184_s2 + $0x10] sm:$0xff] }
   0x4   :  { %765 = vmatprep.subr.msk.bf16.mxu0 %vm904_vm1, %v763_v4  ;;  %v54_v11 = vld [vmem:[%s1184_s2] sm:$0xff]  ;;  %70 = vperm.xlu1 %836, %v56_v12   ;;  %v775_v13 = vpack.c.bf16 %v39_v10, %v38_v9  ;;  %v55_v14 = vld [vmem:[%s1184_s2 + $0x8] sm:$0xff]  ;;  %v57_v15 = vld [vmem:[%s1184_s2 + $0x18] sm:$0xff] }
   0x5   :  { %768 = vmatpush3.bf16.xpose.msk.msra.mxu0 %vm904_vm1, %v763_v4  ;;  %60 = vperm.xlu0 %835, %v54_v11   ;;  %v232_v16 = vld [vmem:[%s1185_s4] sm:$0xff]  ;;  %v40_v17 = vld [vmem:[%s1182_s0 + $0x30] sm:$0xff]  ;;  %v41_v18 = vld [vmem:[%s1182_s0 + $0x38] sm:$0xff] }
   0x6   :  { %771 = vmatprep.subr.msk.bf16.mxu0 %vm904_vm1, %v769_v7  ;;  %v233_v19 = vld [vmem:[%s1185_s4 + $0x8] sm:$0xff]  ;;  %v781_v20 = vpack.c.bf16 %v41_v18, %v40_v17  ;;  %v234_v21 = vld [vmem:[%s1185_s4 + $0x10] sm:$0xff]  ;;  %v235_v22 = vld [vmem:[%s1185_s4 + $0x18] sm:$0xff] }
   0x7   :  { %v439_v23 = vld [vmem:[%s1186_s8] sm:$0xff]  ;;  %v43_v25 = vld [vmem:[%s1182_s0 + $0x48] sm:$0xff]  ;;  %v44_v28 = vld [vmem:[%s1182_s0 + $0x50] sm:$0xff] }
   0x8   :  { %75 = vperm.xlu1 %836, %v57_v15   ;;  %v42_v24 = vld [vmem:[%s1182_s0 + $0x40] sm:$0xff]  ;;  %v45_v29 = vld [vmem:[%s1182_s0 + $0x58] sm:$0xff]  ;;  %v47_v32 = vld [vmem:[%s1182_s0 + $0x68] sm:$0xff] }
   0x9   :  { %65 = vperm.xlu0 %835, %v55_v14   ;;  %v359_v26 = vld [vmem:[%s1187_s6] sm:$0xff]  ;;  %v787_v27 = vpack.c.bf16 %v43_v25, %v42_v24  ;;  %v793_v30 = vpack.c.bf16 %v45_v29, %v44_v28  ;;  %v48_v34 = vld [vmem:[%s1182_s0 + $0x70] sm:$0xff]  ;;  %v49_v35 = vld [vmem:[%s1182_s0 + $0x78] sm:$0xff] }
   0xa   :  { %v46_v31 = vld [vmem:[%s1182_s0 + $0x60] sm:$0xff]  ;;  %v805_v36 = vpack.c.bf16 %v49_v35, %v48_v34  ;;  %v51_v37 = vld [vmem:[%s1183_s1 + $0x8] sm:$0xff]  ;;  %v52_v38 = vld [vmem:[%s1183_s1 + $0x10] sm:$0xff] }
   0xb   :  { %v799_v33 = vpack.c.bf16 %v47_v32, %v46_v31  ;;  %v53_v39 = vld [vmem:[%s1183_s1 + $0x18] sm:$0xff]  ;;  %v228_v40 = vld [vmem:[%s1188_s3] sm:$0xff]  ;;  %v229_v59 = vld [vmem:[%s1188_s3 + $0x8] sm:$0xff] }
   0xc   :  { %243 = vperm.xlu1 %836, %v233_v19   ;;  %735 = vmatprep.mubr.msk.f32.mxu1 %vm256_vm2, %v228_v40  ;;  %v230_v60 = vld [vmem:[%s1188_s3 + $0x10] sm:$0xff]  ;;  %v231_v61 = vld [vmem:[%s1188_s3 + $0x18] sm:$0xff]  ;;  %v358_v18 = vld [vmem:[%s1189_s5] sm:$0xff] }
   0xd   :  { %774 = vmatpush3.bf16.xpose.msk.msra.mxu0 %vm904_vm1, %v769_v7  ;;  %238 = vperm.xlu0 %835, %v232_v16   ;;  %v438_v19 = vld [vmem:[%s1190_s7] sm:$0xff] }
   0xe   :  { %777 = vmatprep.subr.msk.bf16.mxu0 %vm904_vm1, %v775_v13 }
  0x10   :  { %253 = vperm.xlu1 %836, %v235_v22  }
  0x11   :  { %248 = vperm.xlu0 %835, %v234_v21  }
  0x14   :  { %362 = vperm.xlu1 %836, %v359_v26  }
  0x15   :  { %780 = vmatpush3.bf16.xpose.msk.msra.mxu0 %vm904_vm1, %v775_v13  ;;  %442 = vperm.xlu0 %835, %v439_v23  }
  0x16   :  { %783 = vmatprep.subr.msk.bf16.mxu0 %vm904_vm1, %v781_v20 }
  0x1d   :  { %786 = vmatpush3.bf16.xpose.msk.msra.mxu0 %vm904_vm1, %v781_v20 }
  0x1e   :  { %789 = vmatprep.subr.msk.bf16.mxu0 %vm904_vm1, %v787_v27 }
  0x25   :  { %792 = vmatpush3.bf16.xpose.msk.msra.mxu0 %vm904_vm1, %v787_v27 }
  0x26   :  { %795 = vmatprep.subr.msk.bf16.mxu0 %vm904_vm1, %v793_v30 }
  0x2d   :  { %798 = vmatpush3.bf16.xpose.msk.msra.mxu0 %vm904_vm1, %v793_v30 }
  0x2e   :  { %801 = vmatprep.subr.msk.bf16.mxu0 %vm904_vm1, %v799_v33 }
  0x35   :  { %804 = vmatpush3.bf16.xpose.msk.msra.mxu0 %vm904_vm1, %v799_v33 }
  0x36   :  { %807 = vmatprep.subr.msk.bf16.mxu0 %vm904_vm1, %v805_v36 }
  0x3d   :  { %810 = vmatpush3.bf16.xpose.msk.msra.mxu0 %vm904_vm1, %v805_v36 }
  0x44   :  { %722 = vmatmul.mubr.msk.f32.vlgmr.msra.gmra.mrb[0].mxu0 %vm78_vm0, %v51_v37 }
  0x45   :  { %724 = vmatprep.mubr.msk.f32.mxu0 %vm78_vm0, %v52_v38 }
  0x48   :  { %725 = vmatmul.mubr.msk.f32.gmra.mrb[2].mxu0 %vm78_vm0, %v53_v39 }
  0x83   :  { %v71_v42 = vpop.permute.xlu1 %70 }
  0x84   :  { %v61_v41 = vpop.permute.xlu0 %60 }
  0x87   :  { %v76_v49 = vpop.permute.xlu1 %75 }
  0x88   :  { %v66_v43 = vpop.permute.xlu0 %65 }
  0x8b   :  { %v244_v0 = vpop.permute.xlu1 %243 }
  0x8c   :  { %v239_v1 = vpop.permute.xlu0 %238 }
  0x8f   :  { %v254_v7 = vpop.permute.xlu1 %253 }
  0x90   :  { %v249_v10 = vpop.permute.xlu0 %248 }
  0x93   :  { %v363_v20 = vpop.permute.xlu1 %362 }
  0x94   :  { %v443_v24 = vpop.permute.xlu0 %442 }
 0x117   :  { %v723_v44 = vpop.f32.mrb[0].mxu0 }
 0x118   :  { %v211_v45 = vadd.f32 %v723_v44, %v66_v43  ;;  %v205_v46 = vpop.f32.mrb[1].mxu0 }
 0x119   :  { %v206_v47 = vadd.f32 %v205_v46, %v61_v41 }
 0x11a   :  { %v225_v48 = vmax.f32 %v211_v45, 0.0 }
 0x11b   :  { %v224_v50 = vmax.f32 %v206_v47, 0.0  ;;  %v726_v51 = vpop.f32.mrb[2].mxu0 }
 0x11c   :  { %v221_v52 = vadd.f32 %v726_v51, %v76_v49  ;;  %v215_v53 = vpop.f32.mrb[3].mxu0 }
 0x11d   :  { %v216_v54 = vadd.f32 %v215_v53, %v71_v42  ;;  %v811_v55 = vpack.c.bf16 %v225_v48, %v224_v50 }
 0x11e   :  { %v227_v56 = vmax.f32 %v221_v52, 0.0 }
 0x11f   :  { %v226_v57 = vmax.f32 %v216_v54, 0.0  ;;  %812 = vmatprep.subr.bf16.mxu1 %v811_v55 }
 0x120   :  { %814 = vmatpush3.bf16.msra.mxu1 %v811_v55 }
 0x121   :  { %v815_v58 = vpack.c.bf16 %v227_v56, %v226_v57 }
 0x123   :  { %816 = vmatprep.subr.bf16.mxu1 %v815_v58 }
 0x124   :  { %818 = vmatpush3.bf16.msra.mxu1 %v815_v58 }
 0x125   :  { %819 = vmatprep.subr.bf16.mxu1 %v838_v62 }
 0x127   :  { %736 = vmatmul.mubr.msk.f32.vlgmr.msra.gmra.mrb[0].mxu1 %vm256_vm2, %v229_v59 }
 0x128   :  { %738 = vmatprep.mubr.msk.f32.mxu1 %vm256_vm2, %v230_v60 }
 0x12b   :  { %739 = vmatmul.mubr.msk.f32.gmra.mrb[2].mxu1 %vm256_vm2, %v231_v61 }
 0x12c   :  { %749 = vmatprep.mubr.msk.f32.mxu1 %vm839_vm3, %v840_v63 }
 0x1fa   :  { %v737_v2 = vpop.f32.mrb[0].mxu1 }
 0x1fb   :  { %v341_v3 = vadd.f32 %v737_v2, %v244_v0  ;;  %v335_v4 = vpop.f32.mrb[1].mxu1 }
 0x1fc   :  { %v336_v5 = vadd.f32 %v335_v4, %v239_v1 }
 0x1fd   :  { %v355_v6 = vmax.f32 %v341_v3, 0.0 }
 0x1fe   :  { %v354_v8 = vmax.f32 %v336_v5, 0.0  ;;  %v740_v9 = vpop.f32.mrb[2].mxu1 }
 0x1ff   :  { %v351_v11 = vadd.f32 %v740_v9, %v254_v7  ;;  %v345_v12 = vpop.f32.mrb[3].mxu1 }
 0x200   :  { %v820_v13 = vpack.c.bf16 %v355_v6, %v354_v8  ;;  %v346_v14 = vadd.f32 %v345_v12, %v249_v10 }
 0x201   :  { %v357_v15 = vmax.f32 %v351_v11, 0.0 }
 0x202   :  { %v356_v16 = vmax.f32 %v346_v14, 0.0  ;;  %821 = vmatpush3.bf16.msra.mxu1 %v820_v13 }
 0x203   :  { %822 = vmatprep.subr.bf16.mxu1 %v838_v62 }
 0x204   :  { %v823_v17 = vpack.c.bf16 %v357_v15, %v356_v16 }
 0x206   :  { %824 = vmatpush3.bf16.msra.mxu1 %v823_v17 }
 0x207   :  { %825 = vmatprep.subr.bf16.mxu1 %v838_v62 }
 0x209   :  { %750 = vmatmul.mubr.msk.f32.vlgmr.msra.gmra.mrb[4].mxu1 %vm256_vm2, %v358_v18 }
 0x20a   :  { %827 = vmatpush3.bf16.msra.mxu1 %v820_v13  ;;  %760 = vmatprep.mubr.msk.f32.mxu1 %vm839_vm3, %v840_v63 }
 0x20b   :  { %828 = vmatprep.subr.bf16.mxu1 %v838_v62 }
 0x20e   :  { %830 = vmatpush3.bf16.msra.mxu1 %v823_v17 }
 0x211   :  { %761 = vmatmul.mubr.msk.f32.vlgmr.msra.gmra.mrb[6].mxu1 %vm256_vm2, %v438_v19 }
 0x2dc   :  { %v434_v21 = vpop.f32.mrb[4].mxu1 }
 0x2dd   :  { %v435_v22 = vadd.f32 %v434_v21, %v363_v20  ;;  %v751_v23 = vpop.f32.mrb[5].mxu1 }
 0x2df   :  { %520 = vxpose.xlu0.b32.start.end [1/1] (short) %v435_v22, 128 }
 0x2e4   :  { %v514_v25 = vpop.f32.mrb[6].mxu1 }
 0x2e5   :  { %v515_v26 = vadd.f32 %v514_v25, %v443_v24  ;;  %v762_v27 = vpop.f32.mrb[7].mxu1 }
 0x2e7   :  { %v518_v28 = vmax.f32 %v515_v26, -20.0 }
 0x2e9   :  { %v519_v29 = vmin.f32 %v518_v28, 2.0 }
 0x2eb   :  { %569 = vxpose.xlu1.b32.start.end [1/1] (short) %v519_v29, 128 }
 0x35f   :  { %v536_v30 = vpop.trf.xlu0 }
 0x360   :  { %553 = vst.msk [vmem:[%s1191_s9] sm:$0xff] %vm552_vm4, %v536_v30 }
 0x363   :  { %v537_v31 = vpop.trf.xlu0 }
 0x364   :  { %554 = vst.msk [vmem:[%s1191_s9 + $0x8] sm:$0xff] %vm552_vm4, %v537_v31 }
 0x367   :  { %v538_v32 = vpop.trf.xlu0 }
 0x368   :  { %555 = vst.msk [vmem:[%s1191_s9 + $0x10] sm:$0xff] %vm552_vm4, %v538_v32 }
 0x36b   :  { %v585_v33 = vpop.trf.xlu1  ;;  %v539_v34 = vpop.trf.xlu0 }
 0x36c   :  { %601 = vst.msk [vmem:[%s1192_s10] sm:$0xff] %vm552_vm4, %v585_v33  ;;  %556 = vst.msk [vmem:[%s1191_s9 + $0x18] sm:$0xff] %vm552_vm4, %v539_v34 }
 0x36f   :  { %v586_v35 = vpop.trf.xlu1  ;;  %v540_v36 = vpop.trf.xlu0 }
 0x370   :  { %602 = vst.msk [vmem:[%s1192_s10 + $0x8] sm:$0xff] %vm552_vm4, %v586_v35  ;;  %557 = vst.msk [vmem:[%s1191_s9 + $0x20] sm:$0xff] %vm552_vm4, %v540_v36 }
 0x373   :  { %v587_v37 = vpop.trf.xlu1  ;;  %v541_v38 = vpop.trf.xlu0 }
 0x374   :  { %603 = vst.msk [vmem:[%s1192_s10 + $0x10] sm:$0xff] %vm552_vm4, %v587_v37  ;;  %558 = vst.msk [vmem:[%s1191_s9 + $0x28] sm:$0xff] %vm552_vm4, %v541_v38 }
 0x377   :  { %v588_v39 = vpop.trf.xlu1  ;;  %v542_v40 = vpop.trf.xlu0 }
 0x378   :  { %604 = vst.msk [vmem:[%s1192_s10 + $0x18] sm:$0xff] %vm552_vm4, %v588_v39  ;;  %559 = vst.msk [vmem:[%s1191_s9 + $0x30] sm:$0xff] %vm552_vm4, %v542_v40 }
 0x37b   :  { %v589_v41 = vpop.trf.xlu1  ;;  %v543_v42 = vpop.trf.xlu0 }
 0x37c   :  { %605 = vst.msk [vmem:[%s1192_s10 + $0x20] sm:$0xff] %vm552_vm4, %v589_v41  ;;  %560 = vst.msk [vmem:[%s1191_s9 + $0x38] sm:$0xff] %vm552_vm4, %v543_v42 }
 0x37f   :  { %v590_v43 = vpop.trf.xlu1  ;;  %v544_v44 = vpop.trf.xlu0 }
 0x380   :  { %606 = vst.msk [vmem:[%s1192_s10 + $0x28] sm:$0xff] %vm552_vm4, %v590_v43  ;;  %561 = vst.msk [vmem:[%s1191_s9 + $0x40] sm:$0xff] %vm552_vm4, %v544_v44 }
 0x383   :  { %v591_v45 = vpop.trf.xlu1  ;;  %v545_v46 = vpop.trf.xlu0 }
 0x384   :  { %607 = vst.msk [vmem:[%s1192_s10 + $0x30] sm:$0xff] %vm552_vm4, %v591_v45  ;;  %562 = vst.msk [vmem:[%s1191_s9 + $0x48] sm:$0xff] %vm552_vm4, %v545_v46 }
 0x387   :  { %v592_v47 = vpop.trf.xlu1  ;;  %v546_v48 = vpop.trf.xlu0 }
 0x388   :  { %608 = vst.msk [vmem:[%s1192_s10 + $0x38] sm:$0xff] %vm552_vm4, %v592_v47  ;;  %563 = vst.msk [vmem:[%s1191_s9 + $0x50] sm:$0xff] %vm552_vm4, %v546_v48 }
 0x38b   :  { %v593_v49 = vpop.trf.xlu1  ;;  %v547_v50 = vpop.trf.xlu0 }
 0x38c   :  { %609 = vst.msk [vmem:[%s1192_s10 + $0x40] sm:$0xff] %vm552_vm4, %v593_v49  ;;  %564 = vst.msk [vmem:[%s1191_s9 + $0x58] sm:$0xff] %vm552_vm4, %v547_v50 }
 0x38f   :  { %v594_v51 = vpop.trf.xlu1  ;;  %v548_v52 = vpop.trf.xlu0 }
 0x390   :  { %610 = vst.msk [vmem:[%s1192_s10 + $0x48] sm:$0xff] %vm552_vm4, %v594_v51  ;;  %565 = vst.msk [vmem:[%s1191_s9 + $0x60] sm:$0xff] %vm552_vm4, %v548_v52 }
 0x393   :  { %v595_v53 = vpop.trf.xlu1  ;;  %v549_v54 = vpop.trf.xlu0 }
 0x394   :  { %611 = vst.msk [vmem:[%s1192_s10 + $0x50] sm:$0xff] %vm552_vm4, %v595_v53  ;;  %566 = vst.msk [vmem:[%s1191_s9 + $0x68] sm:$0xff] %vm552_vm4, %v549_v54 }
 0x397   :  { %v596_v55 = vpop.trf.xlu1  ;;  %v550_v56 = vpop.trf.xlu0 }
 0x398   :  { %612 = vst.msk [vmem:[%s1192_s10 + $0x58] sm:$0xff] %vm552_vm4, %v596_v55  ;;  %567 = vst.msk [vmem:[%s1191_s9 + $0x70] sm:$0xff] %vm552_vm4, %v550_v56 }
 0x39b   :  { %v597_v57 = vpop.trf.xlu1  ;;  %v551_v58 = vpop.trf.xlu0 }
 0x39c   :  { %613 = vst.msk [vmem:[%s1192_s10 + $0x60] sm:$0xff] %vm552_vm4, %v597_v57  ;;  %568 = vst.msk [vmem:[%s1191_s9 + $0x78] sm:$0xff] %vm552_vm4, %v551_v58 }
 0x39f   :  { %v598_v59 = vpop.trf.xlu1 }
 0x3a0   :  { %614 = vst.msk [vmem:[%s1192_s10 + $0x68] sm:$0xff] %vm552_vm4, %v598_v59 }
 0x3a3   :  { %v599_v60 = vpop.trf.xlu1 }
 0x3a4   :  { %615 = vst.msk [vmem:[%s1192_s10 + $0x70] sm:$0xff] %vm552_vm4, %v599_v60 }
 0x3a7   :  { %v600_v61 = vpop.trf.xlu1 }
 0x3a8   :  { %616 = vst.msk [vmem:[%s1192_s10 + $0x78] sm:$0xff] %vm552_vm4, %v600_v61 }

</bundles_post_ra>
